<compile_context>
chip_gen: v7x
topology: tpu7x:2x2x1
jax: 0.10.0
libtpu: 0.0.40
codegen_flags: <defaults>
</compile_context>

<pallas_src>
import numpy as np

import jax
import jax.numpy as jnp
from jax.experimental import pallas as pl
from jax.experimental.pallas import tpu as pltpu

# Class weights from the torch module (compile-time constants).
PE_W = (0.0736196319, 0.0736196319, 0.09202453988)
RV_LV_W = (0.2346625767, 0.0782208589, 0.0736196319)
PE_TYPE_W = (0.1042944785, 0.1877300613, 0.1042944785, 0.0736196319)
LOCATION_W = (0.1877300613, 0.06257668712, 0.06257668712)
IMAGE_WEIGHTS = 0.0736196319
# NOTE: the torch forward reads `self.image_weight` (typo); interpreted as the
# scalar `self.image_weights` above.
EXAM_WEIGHT_SUM = float(sum(PE_W) + sum(RV_LV_W) + sum(PE_TYPE_W) + sum(LOCATION_W))


def _bce_with_logits(x, y):
    # Numerically stable BCEWithLogitsLoss(reduction='none'):
    #   max(x,0) - x*y + log(1 + exp(-|x|))
    return jnp.maximum(x, 0.0) - x * y + jnp.log(1.0 + jnp.exp(-jnp.abs(x)))


def _weighted_ce_sum(logits, target, weights):
    # CrossEntropyLoss(reduction='none', weight=w)(logits, target).sum()
    #   = sum_j  w[t_j] * (logsumexp(logits_j) - logits_j[t_j])
    m = jnp.max(logits, axis=-1, keepdims=True)
    lse = jnp.log(jnp.sum(jnp.exp(logits - m), axis=-1, keepdims=True)) + m
    cls = jax.lax.broadcasted_iota(jnp.int32, logits.shape, 1)
    onehot = (cls == target).astype(jnp.float32)               # target: (B, 1) int32
    picked = jnp.sum(logits * onehot, axis=-1, keepdims=True)  # (B, 1)
    w_t = jnp.zeros_like(picked)
    for k, wk in enumerate(weights):                           # K <= 4, unrolled
        w_t = w_t + float(wk) * (target == k).astype(jnp.float32)
    return jnp.sum(w_t * (lse - picked))


def _rsna_loss_kernel(meta_i_ref, meta_f_ref, x_ref, y_ref, w_ref,
                      bce_out_ref, w_out_ref, exam_out_ref,
                      bce_acc, w_acc):
    h = pl.program_id(0)          # which sequence half ("parallel")
    s = pl.program_id(1)          # step within the half ("arbitrary")
    ns = pl.num_programs(1)

    @pl.when(s == 0)
    def _init():
        bce_acc[...] = jnp.zeros_like(bce_acc)
        w_acc[...] = jnp.zeros_like(w_acc)

    x = x_ref[...].astype(jnp.float32)          # (B, TL) image logits
    y = y_ref[...].astype(jnp.float32)          # (B, TL) binary labels (bf16 in HBM)
    w = w_ref[...].astype(jnp.float32)          # (B, TL) per-image weights
    B, TL = x.shape

    sl = meta_i_ref[:, 0:1]                     # (B, 1) int32 sequence lengths
    col = jax.lax.broadcasted_iota(jnp.int32, (B, TL), 1) + (h * ns + s) * TL
    valid = col < sl                            # masks seq pad, ragged tail, dup blocks

    # Elementwise BCE + one lane reduce per step (XLU slot is otherwise idle).
    bce = _bce_with_logits(x, y)
    bce_acc[...] += jnp.sum(jnp.where(valid, bce, 0.0), axis=-1, keepdims=True)
    w_acc[...] += jnp.sum(jnp.where(valid, w + IMAGE_WEIGHTS, 0.0),
                          axis=-1, keepdims=True)

    @pl.when(s == ns - 1)
    def _finalize():
        # Lane-dense per-row partials for this half.
        bce_out_ref[...] = jnp.broadcast_to(bce_acc[...][None], (1, B, 128))
        w_out_ref[...] = jnp.broadcast_to(w_acc[...][None], (1, B, 128))

        # Tiny exam-level heads (each half writes the same value; the wrapper
        # reads the h == 0 block).
        f = meta_f_ref[...].astype(jnp.float32)                  # (B, 16)
        pe_logit = f[:, 0:3]
        loc_logit = f[:, 3:6]
        loc_y = f[:, 6:9]
        rvlv_logit = f[:, 9:12]
        pet_logit = f[:, 12:16]
        pe_t = meta_i_ref[:, 1:2]
        rvlv_t = meta_i_ref[:, 2:3]
        pet_t = meta_i_ref[:, 3:4]

        exam = (_weighted_ce_sum(pe_logit, pe_t, PE_W)
                + _weighted_ce_sum(rvlv_logit, rvlv_t, RV_LV_W)
                + _weighted_ce_sum(pet_logit, pet_t, PE_TYPE_W))

        loc_bce = _bce_with_logits(loc_logit, loc_y)
        colk = jax.lax.broadcasted_iota(jnp.int32, loc_bce.shape, 1)
        loc_w = jnp.zeros_like(loc_bce)
        for k, wk in enumerate(LOCATION_W):
            loc_w = loc_w + float(wk) * (colk == k).astype(jnp.float32)
        exam = exam + jnp.sum(loc_bce * loc_w)

        exam_out_ref[...] = jnp.broadcast_to(exam, (1, 1, 128))


def _vmem_plan(batch_size):
    """Pick the streamed tile width (lanes) from this chip's VMEM capacity."""
    sub = ((max(batch_size, 8) + 7) // 8) * 8       # sublane-padded rows per tile
    default_cap = 64 * 1024 * 1024                  # conservative (v7x physical)
    try:
        cap = int(getattr(pltpu.get_tpu_info(), "vmem_capacity_bytes", 0)) or default_cap
    except Exception:
        cap = default_cap
    vmem_limit = (cap * 3) // 4                     # scoped limit we request
    tile_budget = vmem_limit // 2                   # budget for double-buffered streams
    # Per lane-column: logits f32 (4 B) + weights f32 (4 B) + labels bf16 (2 B),
    # each double-buffered by the pipeline.
    per_col = sub * (4 + 4 + 2) * 2
    tl = (tile_budget // per_col) // 128 * 128
    tl = max(128, min(tl, 64 * 1024))
    return tl, int(vmem_limit)


def rsna_split_class_loss(pred, batch):
    """pred = (image_pred [B,L,>=1], exam_pred [B,>=13]); batch has
    'convert_label' [B,L,7] (int), 'image_weight' [B,L] (float), 'seq_len' [B] (int)."""
    image_pred, exam_pred = pred
    label = batch["convert_label"].astype(jnp.int32)
    image_weight = batch["image_weight"].astype(jnp.float32)
    seq_len = batch["seq_len"].astype(jnp.int32)

    B, L = image_pred.shape[0], image_pred.shape[1]

    # --- layout plumbing (wrapper side; no padding of the big streams) ---
    exam_label = jnp.max(label[:, :, 1:], axis=1)                  # [B, 6]
    img_logit = image_pred[..., 0].astype(jnp.float32)             # [B, L] f32
    img_label = label[..., 0].astype(jnp.bfloat16)                 # [B, L] bf16 (0/1 exact)
    img_w = image_weight                                           # [B, L] f32

    ep = exam_pred.astype(jnp.float32)
    meta_f = jnp.concatenate(
        [ep[:, 0:3],                                   # pe logits
         ep[:, 3:6],                                   # location logits
         exam_label[:, 1:4].astype(jnp.float32),       # location targets
         ep[:, 6:9],                                   # rv_lv logits
         ep[:, 9:13]],                                 # pe_type logits
        axis=1)                                        # (B, 16)
    meta_i = jnp.stack(
        [seq_len, exam_label[:, 1], exam_label[:, 4], exam_label[:, 5]],
        axis=1).astype(jnp.int32)                      # (B, 4)

    # --- grid / tiling: VMEM-budgeted tile, two parallel halves over L ---
    tl_budget, vmem_limit = _vmem_plan(B)
    n_half = 2 if L >= 256 else 1                      # megacore split (v7x)
    per_half = -(-L // n_half)
    tl = min(tl_budget, ((per_half + 127) // 128) * 128)
    ns = -(-per_half // tl)                            # sequential steps per half
    nb_tot = -(-L // tl)                               # real seq blocks (last may be ragged)

    def stream_map(h, s):
        # Clamp so a trailing fully-out-of-range block just re-reads the last
        # real block; its logical positions are >= L, so the in-kernel mask
        # drops it (no double counting, no OOB DMA).
        return (0, jnp.minimum(h * ns + s, nb_tot - 1))

    resident = lambda h, s: (0, 0)

    cost = pl.CostEstimate(
        flops=int(8 * B * L + 128 * B),
        transcendentals=int(2 * B * L + 16 * B),
        bytes_accessed=int(B * L * (4 + 4 + 2) + B * 128 + n_half * (2 * B + 1) * 512),
    )

    bce_out, w_out, exam_out = pl.pallas_call(
        _rsna_loss_kernel,
        out_shape=(
            jax.ShapeDtypeStruct((n_half, B, 128), jnp.float32),   # per-row BCE sums
            jax.ShapeDtypeStruct((n_half, B, 128), jnp.float32),   # per-row weight sums
            jax.ShapeDtypeStruct((n_half, 1, 128), jnp.float32),   # exam-head loss
        ),
        grid_spec=pltpu.PrefetchScalarGridSpec(
            num_scalar_prefetch=0,
            grid=(n_half, ns),
            in_specs=[
                pl.BlockSpec((B, 4), resident),        # packed int meta (seq_len, targets)
                pl.BlockSpec((B, 16), resident),       # packed float meta (exam logits/labels)
                pl.BlockSpec((B, tl), stream_map),     # image logits  (f32)
                pl.BlockSpec((B, tl), stream_map),     # image labels  (bf16)
                pl.BlockSpec((B, tl), stream_map),     # image weights (f32)
            ],
            out_specs=(
                pl.BlockSpec((1, B, 128), lambda h, s: (h, 0, 0)),
                pl.BlockSpec((1, B, 128), lambda h, s: (h, 0, 0)),
                pl.BlockSpec((1, 1, 128), lambda h, s: (h, 0, 0)),
            ),
            scratch_shapes=[pltpu.VMEM((B, 1), jnp.float32),
                            pltpu.VMEM((B, 1), jnp.float32)],
        ),
        compiler_params=pltpu.CompilerParams(
            dimension_semantics=("parallel", "arbitrary"),
            vmem_limit_bytes=vmem_limit),
        cost_estimate=cost,
    )(meta_i, meta_f, img_logit, img_label, img_w)

    # --- tiny final combine (a handful of scalar ops; per perf review) ---
    bce_row = jnp.sum(bce_out[:, :, 0], axis=0)        # (B,) masked BCE sums
    w_row = jnp.sum(w_out[:, :, 0], axis=0)            # (B,) sum of (image_weight + IMW)
    exam_loss = exam_out[0, 0, 0]

    slen = seq_len.astype(jnp.float32)
    # image_exam_weight_j = IMAGE_WEIGHTS * mean(image_weight[j, :sl] + IMAGE_WEIGHTS)
    image_exam_w = IMAGE_WEIGHTS * (w_row / jnp.maximum(slen, 1.0))  # seq_len==0 safe
    image_loss = jnp.sum(image_exam_w * bce_row)
    # total_weights contribution: sum_j image_exam_weight_j * sl_j = IMW * sum_j w_row_j
    total_weights = EXAM_WEIGHT_SUM * B + IMAGE_WEIGHTS * jnp.sum(w_row)
    return (exam_loss + image_loss) / total_weights


# ----------------------------- pure-JAX/numpy reference -----------------------------
def _ref_loss(image_pred, exam_pred, label, image_weight, seq_len):
    image_pred = np.asarray(image_pred, np.float32)
    exam_pred = np.asarray(exam_pred, np.float32)
    label = np.asarray(label, np.int64)
    image_weight = np.asarray(image_weight, np.float32)
    seq_len = np.asarray(seq_len, np.int64)

    def bce(x, y):
        return np.maximum(x, 0.0) - x * y + np.log(1.0 + np.exp(-np.abs(x)))

    def wce(logits, t, w):
        m = logits.max(-1, keepdims=True)
        lse = np.log(np.exp(logits - m).sum(-1, keepdims=True)) + m
        picked = np.take_along_axis(logits, t[:, None], axis=-1)
        wt = np.asarray(w, np.float32)[t][:, None]
        return float((wt * (lse - picked)).sum())

    exam_label = label[:, :, 1:].max(axis=1)                       # [B, 6]
    B = exam_pred.shape[0]
    exam_loss = wce(exam_pred[:, 0:3], exam_label[:, 1], PE_W)
    exam_loss += float((bce(exam_pred[:, 3:6], exam_label[:, 1:4].astype(np.float32))
                        * np.asarray(LOCATION_W, np.float32)).sum())
    exam_loss += wce(exam_pred[:, 6:9], exam_label[:, 4], RV_LV_W)
    exam_loss += wce(exam_pred[:, 9:13], exam_label[:, 5], PE_TYPE_W)
    total_weights = EXAM_WEIGHT_SUM * B

    iw = image_weight + IMAGE_WEIGHTS
    image_loss = 0.0
    for j in range(B):
        sl = int(seq_len[j])
        image_exam_weight = IMAGE_WEIGHTS * iw[j, :sl].mean()
        image_loss += float((bce(image_pred[j, :sl, 0],
                                 label[j, :sl, 0].astype(np.float32))
                             * image_exam_weight).sum())
        total_weights += image_exam_weight * sl
    return (exam_loss + image_loss) / total_weights


def _make_case(key, B, L, seq_len_vals):
    ks = jax.random.split(key, 8)
    image_pred = jax.random.normal(ks[0], (B, L, 14), jnp.float32)
    exam_pred = jax.random.normal(ks[1], (B, 13), jnp.float32)
    image_weight = jax.random.uniform(ks[2], (B, L), dtype=jnp.float32)
    # convert_label columns: 0 image pe, 1 binary, 2 pe class (3), 3-4 location,
    # 5 rv_lv class (3), 6 pe_type class (4) — 7 cols so exam_label[:, 5] exists.
    lab01 = jax.random.randint(ks[3], (B, L, 2), 0, 2)
    lab2 = jax.random.randint(ks[4], (B, L, 1), 0, 3)
    lab34 = jax.random.randint(ks[5], (B, L, 2), 0, 2)
    lab5 = jax.random.randint(ks[6], (B, L, 1), 0, 3)
    lab6 = jax.random.randint(ks[7], (B, L, 1), 0, 4)
    label = jnp.concatenate([lab01, lab2, lab34, lab5, lab6], axis=-1).astype(jnp.int32)
    seq_len = jnp.array(seq_len_vals, dtype=jnp.int32)
    batch = {"convert_label": label, "image_weight": image_weight, "seq_len": seq_len}
    return (image_pred, exam_pred), batch


if __name__ == "__main__":
    key = jax.random.PRNGKey(0)
    k1, k2 = jax.random.split(key)

    # Case 1: tiny (B=2, L=8) — single half, single (partial) block.
    pred, batch = _make_case(k1, 2, 8, [6, 8])
    loss = rsna_split_class_loss(pred, batch)
    jax.block_until_ready(loss)
    ref = _ref_loss(pred[0], pred[1], batch["convert_label"],
                    batch["image_weight"], batch["seq_len"])
    assert np.allclose(np.asarray(loss), ref, rtol=1e-4, atol=1e-5), (loss, ref)

    # Case 2: B=2, L=384 — two parallel halves + ragged last block + seq masking.
    pred, batch = _make_case(k2, 2, 384, [384, 201])
    loss = rsna_split_class_loss(pred, batch)
    jax.block_until_ready(loss)
    ref = _ref_loss(pred[0], pred[1], batch["convert_label"],
                    batch["image_weight"], batch["seq_len"])
    assert np.allclose(np.asarray(loss), ref, rtol=1e-4, atol=1e-5), (loss, ref)

    print("KERNEL_OK")
</pallas_src>

<mosaic_0001>
module attributes {stable_mosaic.version = 11 : i64} {
  func.func @_rsna_loss_kernel(%arg0: i32, %arg1: i32, %arg2: memref<2x4xi32, #tpu.memory_space<vmem>>, %arg3: memref<2x16xf32, #tpu.memory_space<vmem>>, %arg4: memref<2x128xf32, #tpu.memory_space<vmem>>, %arg5: memref<2x128xbf16, #tpu.memory_space<vmem>>, %arg6: memref<2x128xf32, #tpu.memory_space<vmem>>, %arg7: memref<1x2x128xf32, #tpu.memory_space<vmem>>, %arg8: memref<1x2x128xf32, #tpu.memory_space<vmem>>, %arg9: memref<1x1x128xf32, #tpu.memory_space<vmem>>, %arg10: memref<2x1xf32, #tpu.memory_space<vmem>>, %arg11: memref<2x1xf32, #tpu.memory_space<vmem>>) attributes {dimension_semantics = [#tpu.dimension_semantics<parallel>, #tpu.dimension_semantics<arbitrary>], iteration_bounds = array<i64: 1, 1>, scalar_prefetch = 0 : i64, scratch_operands = 2 : i64, tpu.core_type = #tpu.core_type<tc>, window_params = [{pipeline_mode = #tpu.pipeline_mode<synchronous>, transform_indices = @transform_0, window_bounds = array<i64: 2, 4>}, {pipeline_mode = #tpu.pipeline_mode<synchronous>, transform_indices = @transform_1, window_bounds = array<i64: 2, 16>}, {transform_indices = @transform_2, window_bounds = array<i64: 2, 128>}, {transform_indices = @transform_3, window_bounds = array<i64: 2, 128>}, {transform_indices = @transform_4, window_bounds = array<i64: 2, 128>}, {transform_indices = @transform_5, window_bounds = array<i64: 1, 2, 128>}, {transform_indices = @transform_6, window_bounds = array<i64: 1, 2, 128>}, {transform_indices = @transform_7, window_bounds = array<i64: 1, 1, 128>}]} {
    %c0_i32 = arith.constant 0 : i32
    %0 = arith.cmpi eq, %arg1, %c0_i32 : i32
    %1 = arith.extui %0 : i1 to i32
    %c0_i32_0 = arith.constant 0 : i32
    %2 = arith.cmpi ne, %1, %c0_i32_0 : i32
    scf.if %2 {
      %cst_25 = arith.constant 0.000000e+00 : f32
      %47 = vector.broadcast %cst_25 : f32 to vector<2x1xf32>
      %c0_26 = arith.constant 0 : index
      %c0_27 = arith.constant 0 : index
      %48 = vector.load %arg10[%c0_26, %c0_27] : memref<2x1xf32, #tpu.memory_space<vmem>>, vector<2x1xf32>
      tpu.vector_store %arg10[%c0_26, %c0_27], %47 {strides = array<i32>} : memref<2x1xf32, #tpu.memory_space<vmem>>, vector<2x1xf32>,
      %cst_28 = arith.constant 0.000000e+00 : f32
      %49 = vector.broadcast %cst_28 : f32 to vector<2x1xf32>
      %c0_29 = arith.constant 0 : index
      %c0_30 = arith.constant 0 : index
      %50 = vector.load %arg11[%c0_29, %c0_30] : memref<2x1xf32, #tpu.memory_space<vmem>>, vector<2x1xf32>
      tpu.vector_store %arg11[%c0_29, %c0_30], %49 {strides = array<i32>} : memref<2x1xf32, #tpu.memory_space<vmem>>, vector<2x1xf32>,
    } else {
    }
    %c0 = arith.constant 0 : index
    %c0_1 = arith.constant 0 : index
    %3 = vector.load %arg4[%c0, %c0_1] : memref<2x128xf32, #tpu.memory_space<vmem>>, vector<2x128xf32>
    %c0_2 = arith.constant 0 : index
    %c0_3 = arith.constant 0 : index
    %4 = vector.load %arg5[%c0_2, %c0_3] : memref<2x128xbf16, #tpu.memory_space<vmem>>, vector<2x128xbf16>
    %5 = arith.extf %4 : vector<2x128xbf16> to vector<2x128xf32>
    %c0_4 = arith.constant 0 : index
    %c0_5 = arith.constant 0 : index
    %6 = vector.load %arg6[%c0_4, %c0_5] : memref<2x128xf32, #tpu.memory_space<vmem>>, vector<2x128xf32>
    %c0_6 = arith.constant 0 : index
    %c0_7 = arith.constant 0 : index
    %7 = vector.load %arg2[%c0_6, %c0_7] : memref<2x4xi32, #tpu.memory_space<vmem>>, vector<2x1xi32>
    %8 = tpu.iota {dimensions = array<i32: 1>} : vector<2x128xi32>
    %c1_i32 = arith.constant 1 : i32
    %9 = arith.muli %arg0, %c1_i32 : i32
    %10 = arith.addi %9, %arg1 : i32
    %c128_i32 = arith.constant 128 : i32
    %11 = arith.muli %10, %c128_i32 : i32
    %12 = vector.broadcast %11 : i32 to vector<2x128xi32>
    %13 = arith.addi %8, %12 : vector<2x128xi32>
    %14 = vector.broadcast %7 : vector<2x1xi32> to vector<2x128xi32>
    %15 = arith.cmpi slt, %13, %14 : vector<2x128xi32>
    %cst = arith.constant 0.000000e+00 : f32
    %16 = vector.broadcast %cst : f32 to vector<2x128xf32>
    %17 = arith.maximumf %3, %16 : vector<2x128xf32>
    %18 = arith.mulf %3, %5 : vector<2x128xf32>
    %19 = arith.subf %17, %18 : vector<2x128xf32>
    %20 = math.absf %3 : vector<2x128xf32>
    %cst_8 = arith.constant 0.000000e+00 : f32
    %21 = vector.broadcast %cst_8 : f32 to vector<2x128xf32>
    %22 = arith.subf %21, %20 : vector<2x128xf32>
    %23 = math.exp %22 : vector<2x128xf32>
    %cst_9 = arith.constant 1.000000e+00 : f32
    %24 = vector.broadcast %cst_9 : f32 to vector<2x128xf32>
    %25 = arith.addf %24, %23 : vector<2x128xf32>
    %26 = math.log %25 : vector<2x128xf32>
    %27 = arith.addf %19, %26 : vector<2x128xf32>
    %c0_10 = arith.constant 0 : index
    %c0_11 = arith.constant 0 : index
    %28 = vector.load %arg10[%c0_10, %c0_11] : memref<2x1xf32, #tpu.memory_space<vmem>>, vector<2x1xf32>
    %cst_12 = arith.constant 0.000000e+00 : f32
    %29 = vector.broadcast %cst_12 : f32 to vector<2x128xf32>
    %30 = arith.select %15, %27, %29 : vector<2x128xi1>, vector<2x128xf32>
    %cst_13 = arith.constant dense<0.000000e+00> : vector<2xf32>
    %31 = vector.multi_reduction <add>, %30, %cst_13 [1] : vector<2x128xf32> to vector<2xf32>
    %32 = vector.shape_cast %31 : vector<2xf32> to vector<2x1xf32>
    %33 = arith.addf %28, %32 : vector<2x1xf32>
    %c0_14 = arith.constant 0 : index
    %c0_15 = arith.constant 0 : index
    %34 = vector.load %arg10[%c0_14, %c0_15] : memref<2x1xf32, #tpu.memory_space<vmem>>, vector<2x1xf32>
    tpu.vector_store %arg10[%c0_14, %c0_15], %33 {strides = array<i32>} : memref<2x1xf32, #tpu.memory_space<vmem>>, vector<2x1xf32>,
    %c0_16 = arith.constant 0 : index
    %c0_17 = arith.constant 0 : index
    %35 = vector.load %arg11[%c0_16, %c0_17] : memref<2x1xf32, #tpu.memory_space<vmem>>, vector<2x1xf32>
    %cst_18 = arith.constant 0.0736196339 : f32
    %36 = vector.broadcast %cst_18 : f32 to vector<2x128xf32>
    %37 = arith.addf %6, %36 : vector<2x128xf32>
    %cst_19 = arith.constant 0.000000e+00 : f32
    %38 = vector.broadcast %cst_19 : f32 to vector<2x128xf32>
    %39 = arith.select %15, %37, %38 : vector<2x128xi1>, vector<2x128xf32>
    %cst_20 = arith.constant dense<0.000000e+00> : vector<2xf32>
    %40 = vector.multi_reduction <add>, %39, %cst_20 [1] : vector<2x128xf32> to vector<2xf32>
    %41 = vector.shape_cast %40 : vector<2xf32> to vector<2x1xf32>
    %42 = arith.addf %35, %41 : vector<2x1xf32>
    %c0_21 = arith.constant 0 : index
    %c0_22 = arith.constant 0 : index
    %43 = vector.load %arg11[%c0_21, %c0_22] : memref<2x1xf32, #tpu.memory_space<vmem>>, vector<2x1xf32>
    tpu.vector_store %arg11[%c0_21, %c0_22], %42 {strides = array<i32>} : memref<2x1xf32, #tpu.memory_space<vmem>>, vector<2x1xf32>,
    %c0_i32_23 = arith.constant 0 : i32
    %44 = arith.cmpi eq, %arg1, %c0_i32_23 : i32
    %45 = arith.extui %44 : i1 to i32
    %c0_i32_24 = arith.constant 0 : i32
    %46 = arith.cmpi ne, %45, %c0_i32_24 : i32
    scf.if %46 {
      %c0_25 = arith.constant 0 : index
      %c0_26 = arith.constant 0 : index
      %47 = vector.load %arg10[%c0_25, %c0_26] : memref<2x1xf32, #tpu.memory_space<vmem>>, vector<2x1xf32>
      %48 = vector.shape_cast %47 : vector<2x1xf32> to vector<1x2x1xf32>
      %49 = vector.shape_cast %48 : vector<1x2x1xf32> to vector<1x2x1xf32>
      %50 = vector.broadcast %49 : vector<1x2x1xf32> to vector<1x2x128xf32>
      %c0_27 = arith.constant 0 : index
      %c0_28 = arith.constant 0 : index
      %c0_29 = arith.constant 0 : index
      %51 = vector.load %arg7[%c0_27, %c0_28, %c0_29] : memref<1x2x128xf32, #tpu.memory_space<vmem>>, vector<1x2x128xf32>
      tpu.vector_store %arg7[%c0_27, %c0_28, %c0_29], %50 {strides = array<i32>} : memref<1x2x128xf32, #tpu.memory_space<vmem>>, vector<1x2x128xf32>,
      %c0_30 = arith.constant 0 : index
      %c0_31 = arith.constant 0 : index
      %52 = vector.load %arg11[%c0_30, %c0_31] : memref<2x1xf32, #tpu.memory_space<vmem>>, vector<2x1xf32>
      %53 = vector.shape_cast %52 : vector<2x1xf32> to vector<1x2x1xf32>
      %54 = vector.shape_cast %53 : vector<1x2x1xf32> to vector<1x2x1xf32>
      %55 = vector.broadcast %54 : vector<1x2x1xf32> to vector<1x2x128xf32>
      %c0_32 = arith.constant 0 : index
      %c0_33 = arith.constant 0 : index
      %c0_34 = arith.constant 0 : index
      %56 = vector.load %arg8[%c0_32, %c0_33, %c0_34] : memref<1x2x128xf32, #tpu.memory_space<vmem>>, vector<1x2x128xf32>
      tpu.vector_store %arg8[%c0_32, %c0_33, %c0_34], %55 {strides = array<i32>} : memref<1x2x128xf32, #tpu.memory_space<vmem>>, vector<1x2x128xf32>,
      %c0_35 = arith.constant 0 : index
      %c0_36 = arith.constant 0 : index
      %57 = vector.load %arg3[%c0_35, %c0_36] : memref<2x16xf32, #tpu.memory_space<vmem>>, vector<2x16xf32>
      %58 = vector.extract_strided_slice %57 {offsets = [0, 0], sizes = [2, 3], strides = [1, 1]} : vector<2x16xf32> to vector<2x3xf32>
      %59 = vector.extract_strided_slice %57 {offsets = [0, 3], sizes = [2, 3], strides = [1, 1]} : vector<2x16xf32> to vector<2x3xf32>
      %60 = vector.extract_strided_slice %57 {offsets = [0, 6], sizes = [2, 3], strides = [1, 1]} : vector<2x16xf32> to vector<2x3xf32>
      %61 = vector.extract_strided_slice %57 {offsets = [0, 9], sizes = [2, 3], strides = [1, 1]} : vector<2x16xf32> to vector<2x3xf32>
      %62 = vector.extract_strided_slice %57 {offsets = [0, 12], sizes = [2, 4], strides = [1, 1]} : vector<2x16xf32> to vector<2x4xf32>
      %c0_37 = arith.constant 0 : index
      %c1 = arith.constant 1 : index
      %63 = vector.load %arg2[%c0_37, %c1] : memref<2x4xi32, #tpu.memory_space<vmem>>, vector<2x1xi32>
      %c0_38 = arith.constant 0 : index
      %c2 = arith.constant 2 : index
      %64 = vector.load %arg2[%c0_38, %c2] : memref<2x4xi32, #tpu.memory_space<vmem>>, vector<2x1xi32>
      %c0_39 = arith.constant 0 : index
      %c3 = arith.constant 3 : index
      %65 = vector.load %arg2[%c0_39, %c3] : memref<2x4xi32, #tpu.memory_space<vmem>>, vector<2x1xi32>
      %cst_40 = arith.constant dense<0xFF800000> : vector<2xf32>
      %66 = vector.multi_reduction <maximumf>, %58, %cst_40 [1] : vector<2x3xf32> to vector<2xf32>
      %67 = vector.shape_cast %66 : vector<2xf32> to vector<2x1xf32>
      %68 = vector.broadcast %67 : vector<2x1xf32> to vector<2x3xf32>
      %69 = arith.subf %58, %68 : vector<2x3xf32>
      %70 = math.exp %69 : vector<2x3xf32>
      %cst_41 = arith.constant dense<0.000000e+00> : vector<2xf32>
      %71 = vector.multi_reduction <add>, %70, %cst_41 [1] : vector<2x3xf32> to vector<2xf32>
      %72 = vector.shape_cast %71 : vector<2xf32> to vector<2x1xf32>
      %73 = math.log %72 : vector<2x1xf32>
      %74 = arith.addf %73, %67 : vector<2x1xf32>
      %75 = tpu.iota {dimensions = array<i32: 1>} : vector<2x3xi32>
      %76 = vector.broadcast %63 : vector<2x1xi32> to vector<2x3xi32>
      %77 = arith.cmpi eq, %75, %76 : vector<2x3xi32>
      %78 = arith.extui %77 : vector<2x3xi1> to vector<2x3xi32>
      %79 = arith.sitofp %78 : vector<2x3xi32> to vector<2x3xf32>
      %80 = arith.mulf %58, %79 : vector<2x3xf32>
      %cst_42 = arith.constant dense<0.000000e+00> : vector<2xf32>
      %81 = vector.multi_reduction <add>, %80, %cst_42 [1] : vector<2x3xf32> to vector<2xf32>
      %82 = vector.shape_cast %81 : vector<2xf32> to vector<2x1xf32>
      %cst_43 = arith.constant 0.000000e+00 : f32
      %83 = vector.broadcast %cst_43 : f32 to vector<2x1xf32>
      %c0_i32_44 = arith.constant 0 : i32
      %84 = vector.broadcast %c0_i32_44 : i32 to vector<2x1xi32>
      %85 = arith.cmpi eq, %63, %84 : vector<2x1xi32>
      %86 = arith.extui %85 : vector<2x1xi1> to vector<2x1xi32>
      %87 = arith.sitofp %86 : vector<2x1xi32> to vector<2x1xf32>
      %cst_45 = arith.constant 0.0736196339 : f32
      %88 = vector.broadcast %cst_45 : f32 to vector<2x1xf32>
      %89 = arith.mulf %88, %87 : vector<2x1xf32>
      %90 = arith.addf %83, %89 : vector<2x1xf32>
      %c1_i32_46 = arith.constant 1 : i32
      %91 = vector.broadcast %c1_i32_46 : i32 to vector<2x1xi32>
      %92 = arith.cmpi eq, %63, %91 : vector<2x1xi32>
      %93 = arith.extui %92 : vector<2x1xi1> to vector<2x1xi32>
      %94 = arith.sitofp %93 : vector<2x1xi32> to vector<2x1xf32>
      %cst_47 = arith.constant 0.0736196339 : f32
      %95 = vector.broadcast %cst_47 : f32 to vector<2x1xf32>
      %96 = arith.mulf %95, %94 : vector<2x1xf32>
      %97 = arith.addf %90, %96 : vector<2x1xf32>
      %c2_i32 = arith.constant 2 : i32
      %98 = vector.broadcast %c2_i32 : i32 to vector<2x1xi32>
      %99 = arith.cmpi eq, %63, %98 : vector<2x1xi32>
      %100 = arith.extui %99 : vector<2x1xi1> to vector<2x1xi32>
      %101 = arith.sitofp %100 : vector<2x1xi32> to vector<2x1xf32>
      %cst_48 = arith.constant 0.0920245423 : f32
      %102 = vector.broadcast %cst_48 : f32 to vector<2x1xf32>
      %103 = arith.mulf %102, %101 : vector<2x1xf32>
      %104 = arith.addf %97, %103 : vector<2x1xf32>
      %105 = arith.subf %74, %82 : vector<2x1xf32>
      %106 = arith.mulf %104, %105 : vector<2x1xf32>
      %107 = vector.shape_cast %106 : vector<2x1xf32> to vector<1x2x1xf32>
      %cst_49 = arith.constant dense<0.000000e+00> : vector<1xf32>
      %108 = vector.multi_reduction <add>, %107, %cst_49 [1, 2] : vector<1x2x1xf32> to vector<1xf32>
      %109 = vector.shape_cast %108 : vector<1xf32> to vector<1x1x1xf32>
      %110 = vector.extract %109[0, 0, 0] : f32 from vector<1x1x1xf32>
      %cst_50 = arith.constant dense<0xFF800000> : vector<2xf32>
      %111 = vector.multi_reduction <maximumf>, %61, %cst_50 [1] : vector<2x3xf32> to vector<2xf32>
      %112 = vector.shape_cast %111 : vector<2xf32> to vector<2x1xf32>
      %113 = vector.broadcast %112 : vector<2x1xf32> to vector<2x3xf32>
      %114 = arith.subf %61, %113 : vector<2x3xf32>
      %115 = math.exp %114 : vector<2x3xf32>
      %cst_51 = arith.constant dense<0.000000e+00> : vector<2xf32>
      %116 = vector.multi_reduction <add>, %115, %cst_51 [1] : vector<2x3xf32> to vector<2xf32>
      %117 = vector.shape_cast %116 : vector<2xf32> to vector<2x1xf32>
      %118 = math.log %117 : vector<2x1xf32>
      %119 = arith.addf %118, %112 : vector<2x1xf32>
      %120 = tpu.iota {dimensions = array<i32: 1>} : vector<2x3xi32>
      %121 = vector.broadcast %64 : vector<2x1xi32> to vector<2x3xi32>
      %122 = arith.cmpi eq, %120, %121 : vector<2x3xi32>
      %123 = arith.extui %122 : vector<2x3xi1> to vector<2x3xi32>
      %124 = arith.sitofp %123 : vector<2x3xi32> to vector<2x3xf32>
      %125 = arith.mulf %61, %124 : vector<2x3xf32>
      %cst_52 = arith.constant dense<0.000000e+00> : vector<2xf32>
      %126 = vector.multi_reduction <add>, %125, %cst_52 [1] : vector<2x3xf32> to vector<2xf32>
      %127 = vector.shape_cast %126 : vector<2xf32> to vector<2x1xf32>
      %cst_53 = arith.constant 0.000000e+00 : f32
      %128 = vector.broadcast %cst_53 : f32 to vector<2x1xf32>
      %c0_i32_54 = arith.constant 0 : i32
      %129 = vector.broadcast %c0_i32_54 : i32 to vector<2x1xi32>
      %130 = arith.cmpi eq, %64, %129 : vector<2x1xi32>
      %131 = arith.extui %130 : vector<2x1xi1> to vector<2x1xi32>
      %132 = arith.sitofp %131 : vector<2x1xi32> to vector<2x1xf32>
      %cst_55 = arith.constant 0.234662578 : f32
      %133 = vector.broadcast %cst_55 : f32 to vector<2x1xf32>
      %134 = arith.mulf %133, %132 : vector<2x1xf32>
      %135 = arith.addf %128, %134 : vector<2x1xf32>
      %c1_i32_56 = arith.constant 1 : i32
      %136 = vector.broadcast %c1_i32_56 : i32 to vector<2x1xi32>
      %137 = arith.cmpi eq, %64, %136 : vector<2x1xi32>
      %138 = arith.extui %137 : vector<2x1xi1> to vector<2x1xi32>
      %139 = arith.sitofp %138 : vector<2x1xi32> to vector<2x1xf32>
      %cst_57 = arith.constant 0.0782208592 : f32
      %140 = vector.broadcast %cst_57 : f32 to vector<2x1xf32>
      %141 = arith.mulf %140, %139 : vector<2x1xf32>
      %142 = arith.addf %135, %141 : vector<2x1xf32>
      %c2_i32_58 = arith.constant 2 : i32
      %143 = vector.broadcast %c2_i32_58 : i32 to vector<2x1xi32>
      %144 = arith.cmpi eq, %64, %143 : vector<2x1xi32>
      %145 = arith.extui %144 : vector<2x1xi1> to vector<2x1xi32>
      %146 = arith.sitofp %145 : vector<2x1xi32> to vector<2x1xf32>
      %cst_59 = arith.constant 0.0736196339 : f32
      %147 = vector.broadcast %cst_59 : f32 to vector<2x1xf32>
      %148 = arith.mulf %147, %146 : vector<2x1xf32>
      %149 = arith.addf %142, %148 : vector<2x1xf32>
      %150 = arith.subf %119, %127 : vector<2x1xf32>
      %151 = arith.mulf %149, %150 : vector<2x1xf32>
      %152 = vector.shape_cast %151 : vector<2x1xf32> to vector<1x2x1xf32>
      %cst_60 = arith.constant dense<0.000000e+00> : vector<1xf32>
      %153 = vector.multi_reduction <add>, %152, %cst_60 [1, 2] : vector<1x2x1xf32> to vector<1xf32>
      %154 = vector.shape_cast %153 : vector<1xf32> to vector<1x1x1xf32>
      %155 = vector.extract %154[0, 0, 0] : f32 from vector<1x1x1xf32>
      %156 = arith.addf %110, %155 : f32
      %cst_61 = arith.constant dense<0xFF800000> : vector<2xf32>
      %157 = vector.multi_reduction <maximumf>, %62, %cst_61 [1] : vector<2x4xf32> to vector<2xf32>
      %158 = vector.shape_cast %157 : vector<2xf32> to vector<2x1xf32>
      %159 = vector.broadcast %158 : vector<2x1xf32> to vector<2x4xf32>
      %160 = arith.subf %62, %159 : vector<2x4xf32>
      %161 = math.exp %160 : vector<2x4xf32>
      %cst_62 = arith.constant dense<0.000000e+00> : vector<2xf32>
      %162 = vector.multi_reduction <add>, %161, %cst_62 [1] : vector<2x4xf32> to vector<2xf32>
      %163 = vector.shape_cast %162 : vector<2xf32> to vector<2x1xf32>
      %164 = math.log %163 : vector<2x1xf32>
      %165 = arith.addf %164, %158 : vector<2x1xf32>
      %166 = tpu.iota {dimensions = array<i32: 1>} : vector<2x4xi32>
      %167 = vector.broadcast %65 : vector<2x1xi32> to vector<2x4xi32>
      %168 = arith.cmpi eq, %166, %167 : vector<2x4xi32>
      %169 = arith.extui %168 : vector<2x4xi1> to vector<2x4xi32>
      %170 = arith.sitofp %169 : vector<2x4xi32> to vector<2x4xf32>
      %171 = arith.mulf %62, %170 : vector<2x4xf32>
      %cst_63 = arith.constant dense<0.000000e+00> : vector<2xf32>
      %172 = vector.multi_reduction <add>, %171, %cst_63 [1] : vector<2x4xf32> to vector<2xf32>
      %173 = vector.shape_cast %172 : vector<2xf32> to vector<2x1xf32>
      %cst_64 = arith.constant 0.000000e+00 : f32
      %174 = vector.broadcast %cst_64 : f32 to vector<2x1xf32>
      %c0_i32_65 = arith.constant 0 : i32
      %175 = vector.broadcast %c0_i32_65 : i32 to vector<2x1xi32>
      %176 = arith.cmpi eq, %65, %175 : vector<2x1xi32>
      %177 = arith.extui %176 : vector<2x1xi1> to vector<2x1xi32>
      %178 = arith.sitofp %177 : vector<2x1xi32> to vector<2x1xf32>
      %cst_66 = arith.constant 0.104294479 : f32
      %179 = vector.broadcast %cst_66 : f32 to vector<2x1xf32>
      %180 = arith.mulf %179, %178 : vector<2x1xf32>
      %181 = arith.addf %174, %180 : vector<2x1xf32>
      %c1_i32_67 = arith.constant 1 : i32
      %182 = vector.broadcast %c1_i32_67 : i32 to vector<2x1xi32>
      %183 = arith.cmpi eq, %65, %182 : vector<2x1xi32>
      %184 = arith.extui %183 : vector<2x1xi1> to vector<2x1xi32>
      %185 = arith.sitofp %184 : vector<2x1xi32> to vector<2x1xf32>
      %cst_68 = arith.constant 0.187730059 : f32
      %186 = vector.broadcast %cst_68 : f32 to vector<2x1xf32>
      %187 = arith.mulf %186, %185 : vector<2x1xf32>
      %188 = arith.addf %181, %187 : vector<2x1xf32>
      %c2_i32_69 = arith.constant 2 : i32
      %189 = vector.broadcast %c2_i32_69 : i32 to vector<2x1xi32>
      %190 = arith.cmpi eq, %65, %189 : vector<2x1xi32>
      %191 = arith.extui %190 : vector<2x1xi1> to vector<2x1xi32>
      %192 = arith.sitofp %191 : vector<2x1xi32> to vector<2x1xf32>
      %cst_70 = arith.constant 0.104294479 : f32
      %193 = vector.broadcast %cst_70 : f32 to vector<2x1xf32>
      %194 = arith.mulf %193, %192 : vector<2x1xf32>
      %195 = arith.addf %188, %194 : vector<2x1xf32>
      %c3_i32 = arith.constant 3 : i32
      %196 = vector.broadcast %c3_i32 : i32 to vector<2x1xi32>
      %197 = arith.cmpi eq, %65, %196 : vector<2x1xi32>
      %198 = arith.extui %197 : vector<2x1xi1> to vector<2x1xi32>
      %199 = arith.sitofp %198 : vector<2x1xi32> to vector<2x1xf32>
      %cst_71 = arith.constant 0.0736196339 : f32
      %200 = vector.broadcast %cst_71 : f32 to vector<2x1xf32>
      %201 = arith.mulf %200, %199 : vector<2x1xf32>
      %202 = arith.addf %195, %201 : vector<2x1xf32>
      %203 = arith.subf %165, %173 : vector<2x1xf32>
      %204 = arith.mulf %202, %203 : vector<2x1xf32>
      %205 = vector.shape_cast %204 : vector<2x1xf32> to vector<1x2x1xf32>
      %cst_72 = arith.constant dense<0.000000e+00> : vector<1xf32>
      %206 = vector.multi_reduction <add>, %205, %cst_72 [1, 2] : vector<1x2x1xf32> to vector<1xf32>
      %207 = vector.shape_cast %206 : vector<1xf32> to vector<1x1x1xf32>
      %208 = vector.extract %207[0, 0, 0] : f32 from vector<1x1x1xf32>
      %209 = arith.addf %156, %208 : f32
      %cst_73 = arith.constant 0.000000e+00 : f32
      %210 = vector.broadcast %cst_73 : f32 to vector<2x3xf32>
      %211 = arith.maximumf %59, %210 : vector<2x3xf32>
      %212 = arith.mulf %59, %60 : vector<2x3xf32>
      %213 = arith.subf %211, %212 : vector<2x3xf32>
      %214 = math.absf %59 : vector<2x3xf32>
      %cst_74 = arith.constant 0.000000e+00 : f32
      %215 = vector.broadcast %cst_74 : f32 to vector<2x3xf32>
      %216 = arith.subf %215, %214 : vector<2x3xf32>
      %217 = math.exp %216 : vector<2x3xf32>
      %cst_75 = arith.constant 1.000000e+00 : f32
      %218 = vector.broadcast %cst_75 : f32 to vector<2x3xf32>
      %219 = arith.addf %218, %217 : vector<2x3xf32>
      %220 = math.log %219 : vector<2x3xf32>
      %221 = arith.addf %213, %220 : vector<2x3xf32>
      %222 = tpu.iota {dimensions = array<i32: 1>} : vector<2x3xi32>
      %cst_76 = arith.constant 0.000000e+00 : f32
      %223 = vector.broadcast %cst_76 : f32 to vector<2x3xf32>
      %c0_i32_77 = arith.constant 0 : i32
      %224 = vector.broadcast %c0_i32_77 : i32 to vector<2x3xi32>
      %225 = arith.cmpi eq, %222, %224 : vector<2x3xi32>
      %226 = arith.extui %225 : vector<2x3xi1> to vector<2x3xi32>
      %227 = arith.sitofp %226 : vector<2x3xi32> to vector<2x3xf32>
      %cst_78 = arith.constant 0.187730059 : f32
      %228 = vector.broadcast %cst_78 : f32 to vector<2x3xf32>
      %229 = arith.mulf %228, %227 : vector<2x3xf32>
      %230 = arith.addf %223, %229 : vector<2x3xf32>
      %c1_i32_79 = arith.constant 1 : i32
      %231 = vector.broadcast %c1_i32_79 : i32 to vector<2x3xi32>
      %232 = arith.cmpi eq, %222, %231 : vector<2x3xi32>
      %233 = arith.extui %232 : vector<2x3xi1> to vector<2x3xi32>
      %234 = arith.sitofp %233 : vector<2x3xi32> to vector<2x3xf32>
      %cst_80 = arith.constant 0.0625766888 : f32
      %235 = vector.broadcast %cst_80 : f32 to vector<2x3xf32>
      %236 = arith.mulf %235, %234 : vector<2x3xf32>
      %237 = arith.addf %230, %236 : vector<2x3xf32>
      %c2_i32_81 = arith.constant 2 : i32
      %238 = vector.broadcast %c2_i32_81 : i32 to vector<2x3xi32>
      %239 = arith.cmpi eq, %222, %238 : vector<2x3xi32>
      %240 = arith.extui %239 : vector<2x3xi1> to vector<2x3xi32>
      %241 = arith.sitofp %240 : vector<2x3xi32> to vector<2x3xf32>
      %cst_82 = arith.constant 0.0625766888 : f32
      %242 = vector.broadcast %cst_82 : f32 to vector<2x3xf32>
      %243 = arith.mulf %242, %241 : vector<2x3xf32>
      %244 = arith.addf %237, %243 : vector<2x3xf32>
      %245 = arith.mulf %221, %244 : vector<2x3xf32>
      %246 = vector.shape_cast %245 : vector<2x3xf32> to vector<1x2x3xf32>
      %cst_83 = arith.constant dense<0.000000e+00> : vector<1xf32>
      %247 = vector.multi_reduction <add>, %246, %cst_83 [1, 2] : vector<1x2x3xf32> to vector<1xf32>
      %248 = vector.shape_cast %247 : vector<1xf32> to vector<1x1x1xf32>
      %249 = vector.extract %248[0, 0, 0] : f32 from vector<1x1x1xf32>
      %250 = arith.addf %209, %249 : f32
      %251 = vector.broadcast %250 : f32 to vector<1x1x128xf32>
      %c0_84 = arith.constant 0 : index
      %c0_85 = arith.constant 0 : index
      %c0_86 = arith.constant 0 : index
      %252 = vector.load %arg9[%c0_84, %c0_85, %c0_86] : memref<1x1x128xf32, #tpu.memory_space<vmem>>, vector<1x1x128xf32>
      tpu.vector_store %arg9[%c0_84, %c0_85, %c0_86], %251 {strides = array<i32>} : memref<1x1x128xf32, #tpu.memory_space<vmem>>, vector<1x1x128xf32>,
    } else {
    }
    return
  }
  func.func @transform_0(%arg0: i32, %arg1: i32) -> (i32, i32) {
    %c0_i32 = arith.constant 0 : i32
    %c0_i32_0 = arith.constant 0 : i32
    %c0_i32_1 = arith.constant 0 : i32
    return %c0_i32, %c0_i32_0 : i32, i32
  }
  func.func @transform_1(%arg0: i32, %arg1: i32) -> (i32, i32) {
    %c0_i32 = arith.constant 0 : i32
    %c0_i32_0 = arith.constant 0 : i32
    %c0_i32_1 = arith.constant 0 : i32
    return %c0_i32, %c0_i32_0 : i32, i32
  }
  func.func @transform_2(%arg0: i32, %arg1: i32) -> (i32, i32) {
    %c1_i32 = arith.constant 1 : i32
    %0 = arith.muli %arg0, %c1_i32 : i32
    %1 = arith.addi %0, %arg1 : i32
    %c0_i32 = arith.constant 0 : i32
    %2 = arith.minsi %1, %c0_i32 : i32
    %c0_i32_0 = arith.constant 0 : i32
    %c0_i32_1 = arith.constant 0 : i32
    return %c0_i32_0, %2 : i32, i32
  }
  func.func @transform_3(%arg0: i32, %arg1: i32) -> (i32, i32) {
    %c1_i32 = arith.constant 1 : i32
    %0 = arith.muli %arg0, %c1_i32 : i32
    %1 = arith.addi %0, %arg1 : i32
    %c0_i32 = arith.constant 0 : i32
    %2 = arith.minsi %1, %c0_i32 : i32
    %c0_i32_0 = arith.constant 0 : i32
    %c0_i32_1 = arith.constant 0 : i32
    return %c0_i32_0, %2 : i32, i32
  }
  func.func @transform_4(%arg0: i32, %arg1: i32) -> (i32, i32) {
    %c1_i32 = arith.constant 1 : i32
    %0 = arith.muli %arg0, %c1_i32 : i32
    %1 = arith.addi %0, %arg1 : i32
    %c0_i32 = arith.constant 0 : i32
    %2 = arith.minsi %1, %c0_i32 : i32
    %c0_i32_0 = arith.constant 0 : i32
    %c0_i32_1 = arith.constant 0 : i32
    return %c0_i32_0, %2 : i32, i32
  }
  func.func @transform_5(%arg0: i32, %arg1: i32) -> (i32, i32, i32) {
    %c0_i32 = arith.constant 0 : i32
    %c0_i32_0 = arith.constant 0 : i32
    %c0_i32_1 = arith.constant 0 : i32
    return %arg0, %c0_i32, %c0_i32_0 : i32, i32, i32
  }
  func.func @transform_6(%arg0: i32, %arg1: i32) -> (i32, i32, i32) {
    %c0_i32 = arith.constant 0 : i32
    %c0_i32_0 = arith.constant 0 : i32
    %c0_i32_1 = arith.constant 0 : i32
    return %arg0, %c0_i32, %c0_i32_0 : i32, i32, i32
  }
  func.func @transform_7(%arg0: i32, %arg1: i32) -> (i32, i32, i32) {
    %c0_i32 = arith.constant 0 : i32
    %c0_i32_0 = arith.constant 0 : i32
    %c0_i32_1 = arith.constant 0 : i32
    return %arg0, %c0_i32, %c0_i32_0 : i32, i32, i32
  }
}

</mosaic_0001>

<bundles_post_ra>
// kernel: tpu_custom_call.1
= control target key start
LH: loop header
LB: loop body
LE: loop exit
PB: predicated region body
PF: predicated region fallthrough
CT: control target
= control target key end

     0   :  { %13 = vsyncpa [#allocation5], 0  ;;  %s827_s0 = inlined_call_operand.hbm [shape: s32[2,4], index: 0, kind: input, shape index: {}]   ;;  %s828_s1 = inlined_call_operand.vmem [shape: f32[2,16], index: 1, kind: input, shape index: {}]   ;;  %s829_s2 = inlined_call_operand.vmem [shape: f32[2,8], index: 2, kind: input, shape index: {}]   ;;  %s830_s3 = inlined_call_operand.vmem [shape: bf16[2,8], index: 3, kind: input, shape index: {}]   ;;  %s831_s4 = inlined_call_operand.vmem [shape: f32[2,8], index: 4, kind: input, shape index: {}]   ;;  %s832_s5 = inlined_call_operand.hbm [shape: f32[1,2,128], index: 5, kind: output, shape index: {0}]   ;;  %s833_s6 = inlined_call_operand.hbm [shape: f32[1,2,128], index: 6, kind: output, shape index: {1}]   ;;  %s834_s7 = inlined_call_operand.hbm [shape: f32[1,1,128], index: 7, kind: output, shape index: {2}]  }
   0x1   :  { %14 = vsyncpa [#allocation6], 0 }
   0x2   :  { %15 = vsyncpa [#allocation9], 0  ;;  %s624_s24 = smov [#allocation4]   ;;  %s530_s28 = scalar_lea.hbm %s827_s0, 32 }
   0x3   :  { %s22_s25 = sshll.u32 %s624_s24, 4  ;;  %p531_p0 = scmp.ne.s32.totalorder %s827_s0, %s530_s28  ;;  %s23_s25 = int_to_ptr.vmem [resolvable:$true] %s22_s25 }
   0x4   :  { %p534_p1 = scmp.lt.u32.totalorder %s530_s28, %s827_s0 }
   0x6   :  { %p536_p2 = pnand %p534_p1, %p531_p0 }
   0x8   :  { %539 = shalt.err (!%p536_p2)
}
   0x9   :  { %s540_s10 = scalar_lea.vmem %s23_s25, 32  ;;  %p545_p4 = scmp.lt.s32.totalorder %s23_s25, %s23_s25 }
   0xa   :  { %p541_p3 = scmp.ne.s32.totalorder %s23_s25, %s540_s10  ;;  %p546_p5 = scmp.lt.s32.totalorder %s540_s10, %s540_s10 }
   0xc   :  { %p547_p6 = por %p546_p5, %p545_p4 }
   0xe   :  { %p548_p7 = pnand %p547_p6, %p541_p3 }
  0x10   :  { %551 = shalt.err (!%p548_p7)
}
  0x11   :  { %25 = dma.hbm_to_vmem [thread:$0]  %s827_s0, 32, %s23_s25, [#allocation5]  }
  0x12   :  { %618 = dma.done.wait [#allocation5], 32  }
  0x13   :  { %619 = vsyncadd [#allocation5], 4294967264  ;;  %v625_v0 = vmov 2   ;;  %vm238_vm0 = vcmask 91208   ;;  %v693_v1 = vld [vmem:[#allocation4] sm:$0x3]  ;;  %v127_v7 = vlaneseq }
  0x14   :  { %504 = vset.pattern.permute.xlu0 %v625_v0  ;;  %v698_v2 = vld [vmem:[%s828_s1] sm:$0x3]  ;;  %vm296_vm1 = vcmask 124000   ;;  %v626_v5 = vmov 3   ;;  %v627_v6 = vmov 1   ;;  %v628_v10 = vmov 0.0  }
  0x15   :  { %256 = vperm.xlu0 %504, %v693_v1   ;;  %v239_v3 = vsel %vm238_vm0, %v698_v2, -inf  ;;  %v297_v4 = vsel %vm296_vm1, %v698_v2, -inf  ;;  %506 = vset.pattern.permute.xlu1 %v627_v6  ;;  %v705_v8 = vand.u32 127, %v127_v7  ;;  %s629_s0 = smov 9   ;;  %s630_s1 = smov 12   ;;  %vm184_vm4 = vcmask 17408  }
  0x16   :  { %240 = vmax.xlane.f32.xlu1 %v239_v3  ;;  %s631_s15 = smov 119   ;;  %s632_s16 = smov 116   ;;  %v185_v22 = vsel %vm184_vm4, %v698_v2, -inf  ;;  %v633_v23 = vmov 0   ;;  %vm307_vm9 = vcmask 25600   ;;  %vm207_vm10 = vcmp.eq.s32.totalorder %v693_v1, 0 }
  0x17   :  { %s634_s17 = smov 125   ;;  %vm375_vm6 = vcmp.eq.s32.totalorder %v705_v8, 0  ;;  %vm380_vm7 = vcmp.eq.s32.totalorder %v705_v8, 1  ;;  %vm385_vm8 = vcmp.eq.s32.totalorder %v705_v8, 2  ;;  %s635_s18 = smov 3   ;;  %vm212_vm11 = vcmp.eq.s32.totalorder %v693_v1, 1 }
  0x18   :  { %v476_v39 = vsel %vm375_vm6, 1.0, %v628_v10  ;;  %v477_v40 = vsel %vm380_vm7, 1.0, %v628_v10  ;;  %v478_v43 = vsel %vm385_vm8, 1.0, %v628_v10  ;;  %vm217_vm12 = vcmp.eq.s32.totalorder %v693_v1, 2  ;;  %v126_v61 = vld [vmem:[#allocation4] sm:$0x3] }
  0x19   :  { %505 = vset.pattern.permute.xlu0 %v626_v5  ;;  %v378_v41 = vmul.f32 0.18773006, %v476_v39  ;;  %v383_v42 = vmul.f32 0.06257669, %v477_v40  ;;  %v388_v45 = vmul.f32 0.06257669, %v478_v43 }
  0x1a   :  { %315 = vperm.xlu0 %505, %v693_v1   ;;  %298 = vmax.xlane.f32.xlu1 %v297_v4  ;;  %v470_v53 = vsel %vm207_vm10, 1.0, %v628_v10  ;;  %v471_v54 = vsel %vm212_vm11, 1.0, %v628_v10  ;;  %v749_v57 = vsel %vm217_vm12, 1.0, %v628_v10  ;;  %vm119_vm13 = vcmask 1024   ;;  %v122_v62 = vld [vmem:[%s829_s2] sm:$0x3] }
  0x1b   :  { %v384_v44 = vadd.f32 %v383_v42, %v378_v41  ;;  %v273_v55 = vmul.f32 0.23466258, %v470_v53  ;;  %v275_v56 = vmul.f32 0.07822086, %v471_v54  ;;  %v277_v59 = vmul.f32 0.073619634, %v749_v57 }
  0x1c   :  { %121 = vst.msk [vmem:[#allocation3] sm:$0x3] %vm119_vm13, %v628_v10  ;;  %120 = vst.msk [vmem:[#allocation2] sm:$0x3] %vm119_vm13, %v628_v10  ;;  %v140_v63 = vand.u32 2147483647, %v122_v62 }
  0x1d   :  { %v389_v46 = vadd.f32 %v388_v45, %v384_v44  ;;  %v276_v58 = vadd.f32 %v275_v56, %v273_v55  ;;  %vm150_vm14 = vcmask 1041408   ;;  %v210_v39 = vmul.f32 0.073619634, %v470_v53  ;;  %s638_s24 = smov [#allocation8]   ;;  %s639_s26 = smov [#allocation7]  }
  0x1e   :  { %507 = vset.pattern.permute.xlu0 %v633_v23  ;;  %v141_v0 = vsub.f32 0.0, %v140_v63  ;;  %v215_v40 = vmul.f32 0.073619634, %v471_v54  ;;  %v332_v42 = vmul.f32 0.10429448, %v470_v53  ;;  %vm338_vm0 = vcmp.eq.s32.totalorder %v693_v1, 3 }
  0x1f   :  { %v278_v60 = vadd.f32 %v277_v59, %v276_v58  ;;  %v334_v43 = vmul.f32 0.18773006, %v471_v54  ;;  %s428_s25 = sshll.u32 %s638_s24, 4  ;;  %s418_s27 = sshll.u32 %s639_s26, 4  ;;  %s429_s25 = int_to_ptr.vmem [resolvable:$true] %s428_s25  ;;  %s419_s27 = int_to_ptr.vmem [resolvable:$true] %s418_s27 }
  0x20   :  { %v142_v3 = vmul.f32 1.442695, %v141_v0  ;;  %v216_v45 = vadd.f32 %v215_v40, %v210_v39  ;;  %s552_s28 = scalar_lea.vmem %s429_s25, 32  ;;  %p557_p9 = scmp.lt.s32.totalorder %s429_s25, %s429_s25 }
  0x21   :  { %p553_p8 = scmp.ne.s32.totalorder %s429_s25, %s552_s28  ;;  %p558_p10 = scmp.lt.s32.totalorder %s552_s28, %s552_s28 }
  0x23   :  { %v148_v63 = vld [vmem:[#allocation2] sm:$0x3]  ;;  %p559_p11 = por %p558_p10, %p557_p9 }
  0x25   :  { %p560_p12 = pnand %p559_p11, %p553_p8 }
  0x94   :  { %v257_v9 = vpop.permute.xlu0 %256 }
  0x95   :  { %vm258_vm2 = vcmp.eq.s32.totalorder %v705_v8, %v257_v9 }
  0x96   :  { %v473_v11 = vsel %vm258_vm2, 1.0, %v628_v10 }
  0x97   :  { %262 = vrot.lane.b32.xlu1 %v473_v11, %s629_s0 }
  0x99   :  { %v316_v12 = vpop.permute.xlu0 %315 }
  0x9a   :  { %vm317_vm3 = vcmp.eq.s32.totalorder %v705_v8, %v316_v12  ;;  %v123_v12 = vld [vmem:[%s830_s3] sm:$0x1]  ;;  %s636_s3 = smov 127  }
  0x9b   :  { %v474_v13 = vsel %vm317_vm3, 1.0, %v628_v10 }
  0x9c   :  { %321 = vrot.lane.b32.xlu0 %v474_v13, %s630_s1 }
  0xa3   :  { %v711_v14 = vpop.xlane.xlu1 %240 }
  0xa4   :  { %v242_v15 = vsub.f32 %v698_v2, %v711_v14 }
  0xa6   :  { %v243_v16 = vmul.f32 1.442695, %v242_v15  ;;  %v124_v15 = vunpack.c.l.bf16 %v123_v12 }
  0xa7   :  { %v715_v17 = vpop.xlane.xlu1 %298 }
  0xa8   :  { %510 = vpow2.f32 %v243_v16  ;;  %v300_v18 = vsub.f32 %v698_v2, %v715_v17 }
  0xaa   :  { %v301_v19 = vmul.f32 1.442695, %v300_v18 }
  0xac   :  { %512 = vpow2.f32 %v301_v19 }
  0xb2   :  { %v511_v20 = vpop.eup %510 }
  0xb3   :  { %246 = vrot.lane.b32.xlu1 %v511_v20, %s631_s15 }
  0xb6   :  { %v513_v21 = vpop.eup %512 }
  0xb7   :  { %304 = vrot.lane.b32.xlu1 %v513_v21, %s632_s16  ;;  %v137_v21 = vmax.f32 %v122_v62, 0.0 }
  0xbb   :  { %198 = vperm.xlu1 %506, %v693_v1   ;;  %186 = vmax.xlane.f32.xlu0 %v185_v22  ;;  %v138_v22 = vmul.f32 %v124_v15, %v122_v62 }
  0xbf   :  { %508 = vset.pattern.permute.xlu1 %v633_v23 }
 0x109   :  { %v263_v24 = vpop.permute.xlu1 %262 }
 0x10a   :  { %v265_v25 = vmul.f32 %v263_v24, %v698_v2 }
 0x10c   :  { %267 = vrot.lane.b32.xlu1 %v265_v25, %s631_s15 }
 0x10e   :  { %v322_v26 = vpop.permute.xlu0 %321 }
 0x10f   :  { %v324_v27 = vmul.f32 %v322_v26, %v698_v2 }
 0x111   :  { %326 = vrot.lane.b32.xlu1 %v324_v27, %s632_s16  ;;  %v139_v27 = vsub.f32 %v137_v21, %v138_v22 }
 0x125   :  { %v247_v28 = vpop.permute.xlu1 %246 }
 0x126   :  { %v249_v47 = vsel %vm184_vm4, %v247_v28, 0.0 }
 0x129   :  { %v305_v29 = vpop.permute.xlu1 %304 }
 0x12a   :  { %v308_v48 = vsel %vm307_vm9, %v305_v29, 0.0  ;;  %v125_v29 = vld [vmem:[%s831_s4] sm:$0x3]  ;;  %s637_s4 = smov 126  }
 0x13a   :  { %v199_v30 = vpop.permute.xlu1 %198 }
 0x13b   :  { %vm200_vm5 = vcmp.eq.s32.totalorder %v705_v8, %v199_v30 }
 0x13c   :  { %v469_v31 = vsel %vm200_vm5, 1.0, %v628_v10 }
 0x13d   :  { %v203_v32 = vmul.f32 %v469_v31, %v698_v2  ;;  %v158_v31 = vadd.f32 0.073619634, %v125_v29 }
 0x13f   :  { %v204_v33 = vsel %vm184_vm4, %v203_v32, 0.0 }
 0x140   :  { %205 = vadd.xlane.f32.xlu0 %v204_v33 }
 0x148   :  { %v728_v34 = vpop.xlane.xlu0 %186 }
 0x149   :  { %v188_v35 = vsub.f32 %v698_v2, %v728_v34 }
 0x14b   :  { %v189_v36 = vmul.f32 1.442695, %v188_v35 }
 0x14d   :  { %514 = vpow2.f32 %v189_v36 }
 0x14e   :  { %516 = vpow2.f32 %v142_v3 }
 0x156   :  { %362 = vrot.lane.b32.xlu0 %v698_v2, %s634_s17 }
 0x157   :  { %v515_v37 = vpop.eup %514 }
 0x158   :  { %v191_v38 = vsel %vm184_vm4, %v515_v37, 0.0  ;;  %v517_v7 = vpop.eup %516 }
 0x159   :  { %192 = vadd.xlane.f32.xlu1 %v191_v38  ;;  %v144_v11 = vadd.f32 1.0, %v517_v7 }
 0x16a   :  { %391 = vrot.lane.b32.xlu1 %v389_v46, %s635_s18  ;;  %v220_v46 = vmul.f32 0.09202454, %v749_v57 }
 0x175   :  { %250 = vadd.xlane.f32.xlu0 %v249_v47 }
 0x179   :  { %309 = vadd.xlane.f32.xlu0 %v308_v48  ;;  %v335_v48 = vadd.f32 %v334_v43, %v332_v42 }
 0x17e   :  { %v268_v49 = vpop.permute.xlu1 %267 }
 0x17f   :  { %v270_v50 = vsel %vm184_vm4, %v268_v49, 0.0  ;;  %v336_v49 = vmul.f32 0.10429448, %v749_v57 }
 0x180   :  { %271 = vadd.xlane.f32.xlu0 %v270_v50  ;;  %v475_v50 = vsel %vm338_vm0, 1.0, %v628_v10 }
 0x181   :  { %v337_v55 = vadd.f32 %v336_v49, %v335_v48  ;;  %v341_v53 = vmul.f32 0.073619634, %v475_v50 }
 0x183   :  { %v327_v51 = vpop.permute.xlu1 %326  ;;  %v342_v56 = vadd.f32 %v341_v53, %v337_v55 }
 0x184   :  { %v329_v52 = vsel %vm307_vm9, %v327_v51, 0.0  ;;  %v221_v51 = vadd.f32 %v220_v46, %v216_v45 }
 0x185   :  { %330 = vadd.xlane.f32.xlu0 %v329_v52 }
 0x19b   :  { %134 = vperm.xlu0 %507, %v126_v61  }
 0x1cd   :  { %v206_v4 = vpop.xlane.xlu0 %205 }
 0x1d1   :  { %v759_v6 = vpop.permute.xlu0 %362 }
 0x1e6   :  { %v193_v24 = vpop.xlane.xlu1 %192 }
 0x1ea   :  { %v392_v62 = vpop.permute.xlu1 %391 }
 0x202   :  { %v251_v9 = vpop.xlane.xlu0 %250 }
 0x203   :  { %518 = vlog2.f32 %v251_v9  ;;  %v360_v9 = vmax.f32 %v698_v2, 0.0 }
 0x204   :  { %520 = vlog2.f32 %v144_v11  ;;  %v365_v11 = vmul.f32 %v759_v6, %v698_v2 }
 0x205   :  { %522 = vlog2.f32 %v193_v24 }
 0x206   :  { %v310_v13 = vpop.xlane.xlu0 %309 }
 0x207   :  { %524 = vlog2.f32 %v310_v13 }
 0x20d   :  { %v519_v16 = vpop.eup %518  ;;  %v272_v20 = vpop.xlane.xlu0 %271 }
 0x20e   :  { %v253_v18 = vmul.f32 0.6931472, %v519_v16  ;;  %v521_v23 = vpop.eup %520  ;;  %v366_v16 = vsub.f32 %v360_v9, %v365_v11 }
 0x20f   :  { %v146_v28 = vmul.f32 0.6931472, %v521_v23  ;;  %v523_v38 = vpop.eup %522 }
 0x210   :  { %v254_v19 = vadd.f32 %v253_v18, %v711_v14  ;;  %v195_v41 = vmul.f32 0.6931472, %v523_v38 }
 0x211   :  { %v147_v32 = vadd.f32 %v146_v28, %v139_v27  ;;  %v525_v44 = vpop.eup %524 }
 0x212   :  { %v279_v25 = vsub.f32 %v254_v19, %v272_v20  ;;  %v331_v30 = vpop.xlane.xlu0 %330  ;;  %v312_v47 = vmul.f32 0.6931472, %v525_v44 }
 0x214   :  { %v765_v26 = vmul.f32 %v279_v25, %v278_v60  ;;  %v313_v52 = vadd.f32 %v312_v47, %v715_v17  ;;  %v157_v17 = vld [vmem:[#allocation3] sm:$0x3] }
 0x216   :  { %v343_v58 = vsub.f32 %v313_v52, %v331_v30 }
 0x218   :  { %v344_v59 = vmul.f32 %v343_v58, %v342_v56 }
 0x21a   :  { %v135_v14 = vpop.permute.xlu0 %134 }
 0x21b   :  { %vm136_vm15 = vcmp.lt.s32.totalorder %v705_v8, %v135_v14  ;;  %v196_v8 = vadd.f32 %v195_v41, %v728_v34  ;;  %v367_v34 = vand.u32 2147483647, %v698_v2 }
 0x21c   :  { %v159_v33 = vsel %vm136_vm15, %v158_v31, 0.0  ;;  %v149_v35 = vsel %vm136_vm15, %v147_v32, 0.0 }
 0x21d   :  { %v160_v36 = vsel %vm150_vm14, %v159_v33, 0.0  ;;  %v151_v37 = vsel %vm150_vm14, %v149_v35, 0.0  ;;  %v222_v54 = vsub.f32 %v196_v8, %v206_v4  ;;  %v368_v60 = vsub.f32 0.0, %v367_v34 }
 0x21e   :  { %161 = vadd.xlane.f32.xlu1 %v160_v36  ;;  %152 = vadd.xlane.f32.xlu0 %v151_v37 }
 0x21f   :  { %v223_v1 = vmul.f32 %v222_v54, %v221_v51  ;;  %v369_v57 = vmul.f32 1.442695, %v368_v60 }
 0x221   :  { %526 = vpow2.f32 %v369_v57 }
 0x22b   :  { %v527_v10 = vpop.eup %526 }
 0x22c   :  { %v371_v61 = vadd.f32 1.0, %v527_v10 }
 0x22e   :  { %528 = vlog2.f32 %v371_v61 }
 0x22f   :  { %225 = vrot.lane.b32.xlu1 %v223_v1, %s636_s3 }
 0x233   :  { %346 = vrot.lane.b32.xlu1 %v344_v59, %s634_s17 }
 0x238   :  { %v529_v12 = vpop.eup %528 }
 0x239   :  { %v373_v18 = vmul.f32 0.6931472, %v529_v12 }
 0x23b   :  { %v374_v19 = vadd.f32 %v373_v18, %v366_v16 }
 0x23d   :  { %v394_v20 = vmul.f32 %v392_v62, %v374_v19 }
 0x2ab   :  { %v162_v0 = vpop.xlane.xlu1 %161  ;;  %v153_v3 = vpop.xlane.xlu0 %152 }
 0x2ac   :  { %v163_v4 = vadd.f32 %v162_v0, %v157_v17  ;;  %v154_v7 = vadd.f32 %v153_v3, %v148_v63 }
 0x2ae   :  { %164 = vst.msk [vmem:[#allocation3] sm:$0x3] %vm119_vm13, %v163_v4  ;;  %156 = vst.msk [vmem:[#allocation2] sm:$0x3] %vm119_vm13, %v154_v7 }
 0x2af   :  { %v226_v21 = vpop.permute.xlu1 %225 }
 0x2b0   :  { %v228_v22 = vsel %vm119_vm13, %v226_v21, 0.0 }
 0x2b3   :  { %v347_v2 = vpop.permute.xlu1 %346 }
 0x2b4   :  { %v349_v6 = vsel %vm119_vm13, %v347_v2, 0.0 }
 0x2b5   :  { %v175_v13 = vld [vmem:[#allocation3] sm:$0x3]  ;;  %v168_v15 = vld [vmem:[#allocation2] sm:$0x3] }
 0x2b6   :  { %178 = vperm.xlu1 %508, %v175_v13   ;;  %171 = vperm.xlu0 %507, %v168_v15  }
 0x2ba   :  { %282 = vrot.lane.b32.xlu0 %v765_v26, %s637_s4 }
 0x2bb   :  { %509 = vset.pattern.permute.xlu0 %v626_v5 }
 0x2be   :  { %396 = vrot.lane.b32.xlu0 %v394_v20, %s634_s17 }
 0x2dd   :  { %229 = vadd.xlane.f32.xlu0 %v228_v22 }
 0x2e1   :  { %350 = vadd.xlane.f32.xlu0 %v349_v6 }
 0x335   :  { %v179_v23 = vpop.permute.xlu1 %178  ;;  %v172_v24 = vpop.permute.xlu0 %171 }
 0x336   :  { %181 = vst [vmem:[#allocation8] sm:$0x3] %v179_v23  ;;  %174 = vst [vmem:[#allocation7] sm:$0x3] %v172_v24 }
 0x339   :  { %v283_v25 = vpop.permute.xlu0 %282 }
 0x33a   :  { %v285_v26 = vsel %vm119_vm13, %v283_v25, 0.0 }
 0x33b   :  { %286 = vadd.xlane.f32.xlu1 %v285_v26 }
 0x33d   :  { %v397_v5 = vpop.permute.xlu0 %396 }
 0x33e   :  { %v399_v27 = vsel %vm184_vm4, %v397_v5, 0.0 }
 0x33f   :  { %400 = vadd.xlane.f32.xlu0 %v399_v27 }
 0x36a   :  { %v230_v28 = vpop.xlane.xlu0 %229 }
 0x36b   :  { %v231_v29 = vrot.slane %v230_v28, 4 }
 0x36d   :  { %v232_v30 = vadd.f32 %v231_v29, %v230_v28 }
 0x36f   :  { %v233_v31 = vrot.slane %v232_v30, 2 }
 0x371   :  { %v234_v32 = vadd.f32 %v233_v31, %v232_v30 }
 0x373   :  { %v235_v14 = vrot.slane %v234_v32, 1 }
 0x375   :  { %v236_v33 = vadd.f32 %v235_v14, %v234_v32 }
 0x377   :  { %479 = vpush %v236_v33 }
 0x378   :  { %563 = shalt.err (!%p560_p12)
}
 0x379   :  { %s564_s8 = scalar_lea.hbm %s833_s6, 32 }
 0x37a   :  { %p565_p13 = scmp.ne.s32.totalorder %s833_s6, %s564_s8  ;;  %p568_p0 = scmp.lt.u32.totalorder %s564_s8, %s833_s6 }
 0x37c   :  { %p570_p1 = pnand %p568_p0, %p565_p13 }
 0x37e   :  { %573 = shalt.err (!%p570_p1)
}
 0x37f   :  { %431 = dma.vmem_to_hbm [thread:$0]  %s429_s25, 32, %s833_s6, [#allocation9]  }
 0x380   :  { %s574_s0 = scalar_lea.vmem %s419_s27, 32  ;;  %p579_p3 = scmp.lt.s32.totalorder %s419_s27, %s419_s27 }
 0x381   :  { %p575_p2 = scmp.ne.s32.totalorder %s419_s27, %s574_s0  ;;  %p580_p4 = scmp.lt.s32.totalorder %s574_s0, %s574_s0 }
 0x383   :  { %p581_p5 = por %p580_p4, %p579_p3 }
 0x385   :  { %p582_p6 = pnand %p581_p5, %p575_p2 }
 0x387   :  { %585 = shalt.err (!%p582_p6)
}
 0x388   :  { %s586_s16 = scalar_lea.hbm %s832_s5, 32 }
 0x389   :  { %p587_p7 = scmp.ne.s32.totalorder %s832_s5, %s586_s16  ;;  %p590_p8 = scmp.lt.u32.totalorder %s586_s16, %s832_s5 }
 0x38b   :  { %p592_p9 = pnand %p590_p8, %p587_p7 }
 0x38d   :  { %595 = shalt.err (!%p592_p9)
}
 0x38e   :  { %421 = dma.vmem_to_hbm [thread:$0]  %s419_s27, 32, %s832_s5, [#allocation6]   ;;  %v351_v35 = vpop.xlane.xlu0 %350 }
 0x38f   :  { %v352_v36 = vrot.slane %v351_v35, 4  ;;  %s640_s4 = smov [#allocation10]  }
 0x390   :  { %s438_s24 = sshll.u32 %s640_s4, 4  ;;  %s439_s24 = int_to_ptr.vmem [resolvable:$true] %s438_s24 }
 0x391   :  { %v353_v37 = vadd.f32 %v352_v36, %v351_v35  ;;  %s596_s27 = scalar_lea.vmem %s439_s24, 16  ;;  %s600_s28 = scalar_lea.vmem %s439_s24, 32 }
 0x392   :  { %p597_p10 = scmp.ne.s32.totalorder %s439_s24, %s596_s27  ;;  %p601_p11 = scmp.lt.s32.totalorder %s439_s24, %s439_s24 }
 0x393   :  { %v354_v38 = vrot.slane %v353_v37, 2  ;;  %p602_p12 = scmp.lt.s32.totalorder %s600_s28, %s596_s27 }
 0x395   :  { %v355_v43 = vadd.f32 %v354_v38, %v353_v37  ;;  %p603_p13 = por %p602_p12, %p601_p11 }
 0x397   :  { %v356_v47 = vrot.slane %v355_v43, 1  ;;  %p604_p0 = pnand %p603_p13, %p597_p10 }
 0x399   :  { %v357_v52 = vadd.f32 %v356_v47, %v355_v43 }
 0x3a8   :  { %s480_s5 = spop %479 }
 0x3c8   :  { %v287_v39 = vpop.xlane.xlu1 %286 }
 0x3c9   :  { %v288_v40 = vrot.slane %v287_v39, 4 }
 0x3cb   :  { %v289_v41 = vadd.f32 %v288_v40, %v287_v39 }
 0x3cc   :  { %v401_v42 = vpop.xlane.xlu0 %400 }
 0x3cd   :  { %v290_v44 = vrot.slane %v289_v41, 2  ;;  %v402_v45 = vrot.slane %v401_v42, 4 }
 0x3cf   :  { %v291_v46 = vadd.f32 %v290_v44, %v289_v41  ;;  %v403_v8 = vadd.f32 %v402_v45, %v401_v42 }
 0x3d1   :  { %v404_v48 = vrot.slane %v403_v8, 2  ;;  %v292_v49 = vrot.slane %v291_v46, 1 }
 0x3d3   :  { %v405_v50 = vadd.f32 %v404_v48, %v403_v8  ;;  %v293_v51 = vadd.f32 %v292_v49, %v291_v46 }
 0x3d5   :  { %481 = vpush %v293_v51  ;;  %v406_v55 = vrot.slane %v405_v50, 1 }
 0x3d6   :  { %483 = vpush %v357_v52 }
 0x3d7   :  { %v407_v53 = vadd.f32 %v406_v55, %v405_v50 }
 0x3d9   :  { %485 = vpush %v407_v53 }
 0x406   :  { %s482_s22 = spop %481 }
 0x407   :  { %s295_s2 = sadd.f32 %s482_s22, %s480_s5  ;;  %s484_s23 = spop %483 }
 0x409   :  { %s359_s3 = sadd.f32 %s484_s23, %s295_s2 }
 0x40a   :  { %s486_s25 = spop %485 }
 0x40b   :  { %s409_s26 = sadd.f32 %s486_s25, %s359_s3 }
 0x40d   :  { %v410_v54 = vstv %s409_s26 }
 0x40e   :  { %411 = vst [vmem:[#allocation10] sm:$0x1] %v410_v54 }
 0x40f   :  { %607 = shalt.err (!%p604_p0)
}
 0x410   :  { %s608_s8 = scalar_lea.hbm %s834_s7, 16 }
 0x411   :  { %p609_p1 = scmp.ne.s32.totalorder %s834_s7, %s608_s8  ;;  %p612_p2 = scmp.lt.u32.totalorder %s608_s8, %s834_s7 }
 0x413   :  { %p614_p3 = pnand %p612_p2, %p609_p1 }
 0x415   :  { %617 = shalt.err (!%p614_p3)
}
 0x416   :  { %441 = dma.vmem_to_hbm [thread:$0]  %s439_s24, 16, %s834_s7, [#allocation9]  }
 0x417   :  { %620 = dma.done.wait [#allocation6], 32  }
 0x418   :  { %621 = vsyncadd [#allocation6], 4294967264 }
 0x419   :  { %622 = dma.done.wait [#allocation9], 48  }
 0x41a   :  { %623 = vsyncadd [#allocation9], 4294967248 }
 0x41b   :  { %451 = vsyncpa [#allocation5], 1 }
 0x41c   :  { %452 = vsyncpa [#allocation6], 1 }
 0x41d   :  { %453 = vsyncpa [#allocation9], 1 }

</bundles_post_ra>
